<compile_context>
chip_gen: v7x
topology: tpu7x:2x2x1
jax: 0.10.0
libtpu: 0.0.40
codegen_flags: <defaults>
</compile_context>

<pallas_src>
import functools
import math

import jax
import jax.numpy as jnp
import numpy as np
from jax import lax
from jax.experimental import pallas as pl
from jax.experimental.pallas import tpu as pltpu


_TARGET_BLOCK_BYTES = 1 << 20   # ~1 MiB (f32 equivalent) per input block
_VMEM_LIMIT_BYTES = 32 << 20    # explicit scoped-VMEM limit (safe on v5e/v6e/v7x)


def _planes_per_block(num_planes, h, w):
    """Whole planes per grid step: ~1 MiB f32 blocks, >=2 steps when possible,
    and block rows (p*h) a multiple of 8 (sublane tile)."""
    plane_f32_bytes = h * w * 4
    p = max(1, _TARGET_BLOCK_BYTES // plane_f32_bytes)
    p = min(p, num_planes)
    if num_planes >= 2:                       # keep >= 2 grid steps -> v7x megacore split
        p = min(p, pl.cdiv(num_planes, 2))
    m = 8 // math.gcd(h, 8)                   # smallest multiple making p*h % 8 == 0
    return pl.cdiv(p, m) * m


def _ipow(x, n):
    """Static small integer power as repeated VPU multiplies (avoids EUP exp/log)."""
    r = x
    for _ in range(int(n) - 1):
        r = r * x
    return r


def _gdl_kernel(pred_ref, true_ref, out_ref, *, alpha, plane_h):
    # pred_ref/true_ref: (R, W) block = a stack of whole (H, W) image planes.
    # out_ref:           (1, 8, 128) f32 — per-step partial sum (single splat store).
    R, W = pred_ref.shape

    # Border / plane-seam masks, computed once per step (hoisted above both stencils).
    row = lax.broadcasted_iota(jnp.int32, (R, W), 0) % plane_h
    col = lax.broadcasted_iota(jnp.int32, (R, W), 1)
    has_up = row != 0
    has_down = row != plane_h - 1
    has_left = col != 0
    has_right = col != W - 1

    def sobel_abs(x):
        # u[y, x] = x[y-1, x]; d[y, x] = x[y+1, x]; zero outside each plane.
        u = jnp.where(has_up, pltpu.roll(x, 1, axis=0), 0.0)
        d = jnp.where(has_down, pltpu.roll(x, R - 1, axis=0), 0.0)
        s = u + d   # symmetric part     -> SobelY
        a = u - d   # antisymmetric part -> SobelX

        def left(v):    # v[y, x-1]
            return jnp.where(has_left, pltpu.roll(v, 1, axis=1), 0.0)

        def right(v):   # v[y, x+1]
            return jnp.where(has_right, pltpu.roll(v, W - 1, axis=1), 0.0)

        gx = left(a) + 2.0 * a + right(a)
        gy = left(s) + 2.0 * s - right(s)
        return jnp.abs(gx), jnp.abs(gy)

    # Native-dtype DMA, f32 compute (cast per tile, hidden under the pipeline).
    axt, ayt = sobel_abs(true_ref[...].astype(jnp.float32))
    axp, ayp = sobel_abs(pred_ref[...].astype(jnp.float32))

    g_true = axt + ayt
    if alpha == 1.0:
        g_pred = axp + ayp
    elif float(alpha).is_integer() and 1.0 < alpha <= 8.0:
        g_pred = _ipow(axp, alpha) + _ipow(ayp, alpha)
    else:
        g_pred = axp ** alpha + ayp ** alpha

    # Deferred reduction: exactly one block-wide sum per grid step.
    partial = jnp.sum(g_true - g_pred)
    out_ref[...] = jnp.full(out_ref.shape, partial, jnp.float32)


def gradient_difference_loss(pred, true, alpha=1):
    """pred, true: (B, C, H, W). Returns the scalar GDL loss (matches the PyTorch module)."""
    assert pred.shape == true.shape and pred.ndim == 4
    alpha = float(alpha)   # must be static (it is an nn.Module attribute in the spec)
    B, C, H, W = pred.shape
    G = B * C

    P = _planes_per_block(G, H, W)
    steps = pl.cdiv(G, P)
    rows_block = P * H
    rows_total = steps * rows_block

    # Lane-dense 2-D view: rows on sublanes, W on the 128-lane axis (free reshape).
    pred2 = pred.reshape(G * H, W)
    true2 = true.reshape(G * H, W)
    pad_rows = rows_total - G * H
    if pad_rows:
        # Zero planes contribute exactly 0 to the sum -> numerically neutral padding.
        pred2 = jnp.pad(pred2, ((0, pad_rows), (0, 0)))
        true2 = jnp.pad(true2, ((0, pad_rows), (0, 0)))

    partials = pl.pallas_call(
        functools.partial(_gdl_kernel, alpha=alpha, plane_h=H),
        out_shape=jax.ShapeDtypeStruct((steps, 8, 128), jnp.float32),
        grid_spec=pltpu.PrefetchScalarGridSpec(
            num_scalar_prefetch=0,
            grid=(steps,),
            in_specs=[
                pl.BlockSpec((rows_block, W), lambda i: (i, 0)),
                pl.BlockSpec((rows_block, W), lambda i: (i, 0)),
            ],
            out_specs=pl.BlockSpec((1, 8, 128), lambda i: (i, 0, 0)),
        ),
        compiler_params=pltpu.CompilerParams(
            dimension_semantics=("parallel",),     # independent steps -> v7x megacore
            vmem_limit_bytes=_VMEM_LIMIT_BYTES),
    )(pred2, true2)

    # Tiny cross-step reduction + 0.5 * mean scaling in plain JAX.
    total = jnp.sum(partials[:, 0, 0])
    return 0.5 * total / (B * C * H * W)


# ---------------------------------------------------------------------------
# Pure-JAX reference (mirrors the PyTorch forward exactly; XLA conv = cross-corr).
# ---------------------------------------------------------------------------
_SOBEL_X = ((1.0, 2.0, 1.0), (0.0, 0.0, 0.0), (-1.0, -2.0, -1.0))
_SOBEL_Y = ((1.0, 2.0, -1.0), (0.0, 0.0, 0.0), (1.0, 2.0, -1.0))


def gradient_difference_loss_reference(pred, true, alpha=1):
    B, C, H, W = pred.shape
    kx = jnp.broadcast_to(jnp.asarray(_SOBEL_X, jnp.float32), (C, 1, 3, 3))
    ky = jnp.broadcast_to(jnp.asarray(_SOBEL_Y, jnp.float32), (C, 1, 3, 3))

    def grads(im):
        im = im.astype(jnp.float32)

        def conv(k):
            return lax.conv_general_dilated(
                im, k, window_strides=(1, 1), padding=((1, 1), (1, 1)),
                dimension_numbers=("NCHW", "OIHW", "NCHW"),
                feature_group_count=C, precision=lax.Precision.HIGHEST)

        return conv(kx), conv(ky)

    gx_t, gy_t = grads(true)
    gx_p, gy_p = grads(pred)
    grad_true = jnp.abs(gx_t) + jnp.abs(gy_t)
    grad_pred = jnp.abs(gx_p) ** alpha + jnp.abs(gy_p) ** alpha
    return 0.5 * jnp.mean(grad_true - grad_pred)


if __name__ == "__main__":
    # chans=3 as in the module; W sits on the 128-lane axis.
    B, C, H, W = 2, 3, 16, 128
    key = jax.random.PRNGKey(0)
    kp, kt = jax.random.split(key)
    pred = jax.random.normal(kp, (B, C, H, W), dtype=jnp.float32)
    true = jax.random.normal(kt, (B, C, H, W), dtype=jnp.float32)

    loss = jax.block_until_ready(jax.jit(gradient_difference_loss)(pred, true))
    ref = jax.block_until_ready(gradient_difference_loss_reference(pred, true))

    np.testing.assert_allclose(np.asarray(loss), np.asarray(ref),
                               rtol=1e-3, atol=5e-4)
    print("KERNEL_OK")
</pallas_src>

<mosaic_0001>
module attributes {stable_mosaic.version = 11 : i64} {
  func.func @_gdl_kernel(%arg0: i32, %arg1: memref<48x128xf32, #tpu.memory_space<vmem>>, %arg2: memref<48x128xf32, #tpu.memory_space<vmem>>, %arg3: memref<1x8x128xf32, #tpu.memory_space<vmem>>) attributes {dimension_semantics = [#tpu.dimension_semantics<parallel>], iteration_bounds = array<i64: 2>, scalar_prefetch = 0 : i64, scratch_operands = 0 : i64, tpu.core_type = #tpu.core_type<tc>, window_params = [{transform_indices = @transform_0, window_bounds = array<i64: 48, 128>}, {transform_indices = @transform_1, window_bounds = array<i64: 48, 128>}, {transform_indices = @transform_2, window_bounds = array<i64: 1, 8, 128>}]} {
    %0 = tpu.iota {dimensions = array<i32: 0>} : vector<48x128xi32>
    %c16_i32 = arith.constant 16 : i32
    %c0_i32 = arith.constant 0 : i32
    %1 = arith.cmpi eq, %c16_i32, %c0_i32 : i32
    %c1_i32 = arith.constant 1 : i32
    %2 = arith.select %1, %c1_i32, %c16_i32 : i32
    %3 = vector.broadcast %2 : i32 to vector<48x128xi32>
    %4 = arith.remsi %0, %3 : vector<48x128xi32>
    %c0_i32_0 = arith.constant 0 : i32
    %5 = vector.broadcast %c0_i32_0 : i32 to vector<48x128xi32>
    %6 = arith.cmpi ne, %4, %5 : vector<48x128xi32>
    %c0_i32_1 = arith.constant 0 : i32
    %7 = vector.broadcast %c0_i32_1 : i32 to vector<48x128xi32>
    %8 = arith.cmpi slt, %4, %7 : vector<48x128xi32>
    %c0_i32_2 = arith.constant 0 : i32
    %9 = arith.cmpi slt, %2, %c0_i32_2 : i32
    %10 = vector.broadcast %9 : i1 to vector<48x128xi1>
    %11 = vector.broadcast %10 : vector<48x128xi1> to vector<48x128xi1>
    %12 = arith.xori %8, %11 : vector<48x128xi1>
    %13 = arith.andi %12, %6 : vector<48x128xi1>
    %14 = vector.broadcast %2 : i32 to vector<48x128xi32>
    %15 = arith.addi %4, %14 : vector<48x128xi32>
    %16 = arith.select %13, %15, %4 : vector<48x128xi1>, vector<48x128xi32>
    %17 = tpu.iota {dimensions = array<i32: 1>} : vector<48x128xi32>
    %c0_i32_3 = arith.constant 0 : i32
    %18 = vector.broadcast %c0_i32_3 : i32 to vector<48x128xi32>
    %19 = arith.cmpi ne, %16, %18 : vector<48x128xi32>
    %c15_i32 = arith.constant 15 : i32
    %20 = vector.broadcast %c15_i32 : i32 to vector<48x128xi32>
    %21 = arith.cmpi ne, %16, %20 : vector<48x128xi32>
    %c0_i32_4 = arith.constant 0 : i32
    %22 = vector.broadcast %c0_i32_4 : i32 to vector<48x128xi32>
    %23 = arith.cmpi ne, %17, %22 : vector<48x128xi32>
    %c127_i32 = arith.constant 127 : i32
    %24 = vector.broadcast %c127_i32 : i32 to vector<48x128xi32>
    %25 = arith.cmpi ne, %17, %24 : vector<48x128xi32>
    %c0 = arith.constant 0 : index
    %c0_5 = arith.constant 0 : index
    %26 = vector.load %arg2[%c0, %c0_5] : memref<48x128xf32, #tpu.memory_space<vmem>>, vector<48x128xf32>
    %c1_i32_6 = arith.constant 1 : i32
    %27 = tpu.dynamic_rotate %26 by %c1_i32_6 dim 0 : vector<48x128xf32>, i32 -> vector<48x128xf32>
    %cst = arith.constant 0.000000e+00 : f32
    %28 = vector.broadcast %cst : f32 to vector<48x128xf32>
    %29 = arith.select %19, %27, %28 : vector<48x128xi1>, vector<48x128xf32>
    %c47_i32 = arith.constant 47 : i32
    %30 = tpu.dynamic_rotate %26 by %c47_i32 dim 0 : vector<48x128xf32>, i32 -> vector<48x128xf32>
    %cst_7 = arith.constant 0.000000e+00 : f32
    %31 = vector.broadcast %cst_7 : f32 to vector<48x128xf32>
    %32 = arith.select %21, %30, %31 : vector<48x128xi1>, vector<48x128xf32>
    %33 = arith.addf %29, %32 : vector<48x128xf32>
    %34 = arith.subf %29, %32 : vector<48x128xf32>
    %c1_i32_8 = arith.constant 1 : i32
    %35 = tpu.dynamic_rotate %34 by %c1_i32_8 dim 1 : vector<48x128xf32>, i32 -> vector<48x128xf32>
    %cst_9 = arith.constant 0.000000e+00 : f32
    %36 = vector.broadcast %cst_9 : f32 to vector<48x128xf32>
    %37 = arith.select %23, %35, %36 : vector<48x128xi1>, vector<48x128xf32>
    %cst_10 = arith.constant 2.000000e+00 : f32
    %38 = vector.broadcast %cst_10 : f32 to vector<48x128xf32>
    %39 = arith.mulf %38, %34 : vector<48x128xf32>
    %40 = arith.addf %37, %39 : vector<48x128xf32>
    %c127_i32_11 = arith.constant 127 : i32
    %41 = tpu.dynamic_rotate %34 by %c127_i32_11 dim 1 : vector<48x128xf32>, i32 -> vector<48x128xf32>
    %cst_12 = arith.constant 0.000000e+00 : f32
    %42 = vector.broadcast %cst_12 : f32 to vector<48x128xf32>
    %43 = arith.select %25, %41, %42 : vector<48x128xi1>, vector<48x128xf32>
    %44 = arith.addf %40, %43 : vector<48x128xf32>
    %c1_i32_13 = arith.constant 1 : i32
    %45 = tpu.dynamic_rotate %33 by %c1_i32_13 dim 1 : vector<48x128xf32>, i32 -> vector<48x128xf32>
    %cst_14 = arith.constant 0.000000e+00 : f32
    %46 = vector.broadcast %cst_14 : f32 to vector<48x128xf32>
    %47 = arith.select %23, %45, %46 : vector<48x128xi1>, vector<48x128xf32>
    %cst_15 = arith.constant 2.000000e+00 : f32
    %48 = vector.broadcast %cst_15 : f32 to vector<48x128xf32>
    %49 = arith.mulf %48, %33 : vector<48x128xf32>
    %50 = arith.addf %47, %49 : vector<48x128xf32>
    %c127_i32_16 = arith.constant 127 : i32
    %51 = tpu.dynamic_rotate %33 by %c127_i32_16 dim 1 : vector<48x128xf32>, i32 -> vector<48x128xf32>
    %cst_17 = arith.constant 0.000000e+00 : f32
    %52 = vector.broadcast %cst_17 : f32 to vector<48x128xf32>
    %53 = arith.select %25, %51, %52 : vector<48x128xi1>, vector<48x128xf32>
    %54 = arith.subf %50, %53 : vector<48x128xf32>
    %55 = math.absf %44 : vector<48x128xf32>
    %56 = math.absf %54 : vector<48x128xf32>
    %c0_18 = arith.constant 0 : index
    %c0_19 = arith.constant 0 : index
    %57 = vector.load %arg1[%c0_18, %c0_19] : memref<48x128xf32, #tpu.memory_space<vmem>>, vector<48x128xf32>
    %c1_i32_20 = arith.constant 1 : i32
    %58 = tpu.dynamic_rotate %57 by %c1_i32_20 dim 0 : vector<48x128xf32>, i32 -> vector<48x128xf32>
    %cst_21 = arith.constant 0.000000e+00 : f32
    %59 = vector.broadcast %cst_21 : f32 to vector<48x128xf32>
    %60 = arith.select %19, %58, %59 : vector<48x128xi1>, vector<48x128xf32>
    %c47_i32_22 = arith.constant 47 : i32
    %61 = tpu.dynamic_rotate %57 by %c47_i32_22 dim 0 : vector<48x128xf32>, i32 -> vector<48x128xf32>
    %cst_23 = arith.constant 0.000000e+00 : f32
    %62 = vector.broadcast %cst_23 : f32 to vector<48x128xf32>
    %63 = arith.select %21, %61, %62 : vector<48x128xi1>, vector<48x128xf32>
    %64 = arith.addf %60, %63 : vector<48x128xf32>
    %65 = arith.subf %60, %63 : vector<48x128xf32>
    %c1_i32_24 = arith.constant 1 : i32
    %66 = tpu.dynamic_rotate %65 by %c1_i32_24 dim 1 : vector<48x128xf32>, i32 -> vector<48x128xf32>
    %cst_25 = arith.constant 0.000000e+00 : f32
    %67 = vector.broadcast %cst_25 : f32 to vector<48x128xf32>
    %68 = arith.select %23, %66, %67 : vector<48x128xi1>, vector<48x128xf32>
    %cst_26 = arith.constant 2.000000e+00 : f32
    %69 = vector.broadcast %cst_26 : f32 to vector<48x128xf32>
    %70 = arith.mulf %69, %65 : vector<48x128xf32>
    %71 = arith.addf %68, %70 : vector<48x128xf32>
    %c127_i32_27 = arith.constant 127 : i32
    %72 = tpu.dynamic_rotate %65 by %c127_i32_27 dim 1 : vector<48x128xf32>, i32 -> vector<48x128xf32>
    %cst_28 = arith.constant 0.000000e+00 : f32
    %73 = vector.broadcast %cst_28 : f32 to vector<48x128xf32>
    %74 = arith.select %25, %72, %73 : vector<48x128xi1>, vector<48x128xf32>
    %75 = arith.addf %71, %74 : vector<48x128xf32>
    %c1_i32_29 = arith.constant 1 : i32
    %76 = tpu.dynamic_rotate %64 by %c1_i32_29 dim 1 : vector<48x128xf32>, i32 -> vector<48x128xf32>
    %cst_30 = arith.constant 0.000000e+00 : f32
    %77 = vector.broadcast %cst_30 : f32 to vector<48x128xf32>
    %78 = arith.select %23, %76, %77 : vector<48x128xi1>, vector<48x128xf32>
    %cst_31 = arith.constant 2.000000e+00 : f32
    %79 = vector.broadcast %cst_31 : f32 to vector<48x128xf32>
    %80 = arith.mulf %79, %64 : vector<48x128xf32>
    %81 = arith.addf %78, %80 : vector<48x128xf32>
    %c127_i32_32 = arith.constant 127 : i32
    %82 = tpu.dynamic_rotate %64 by %c127_i32_32 dim 1 : vector<48x128xf32>, i32 -> vector<48x128xf32>
    %cst_33 = arith.constant 0.000000e+00 : f32
    %83 = vector.broadcast %cst_33 : f32 to vector<48x128xf32>
    %84 = arith.select %25, %82, %83 : vector<48x128xi1>, vector<48x128xf32>
    %85 = arith.subf %81, %84 : vector<48x128xf32>
    %86 = math.absf %75 : vector<48x128xf32>
    %87 = math.absf %85 : vector<48x128xf32>
    %88 = arith.addf %55, %56 : vector<48x128xf32>
    %89 = arith.addf %86, %87 : vector<48x128xf32>
    %90 = arith.subf %88, %89 : vector<48x128xf32>
    %91 = vector.shape_cast %90 : vector<48x128xf32> to vector<1x48x128xf32>
    %cst_34 = arith.constant dense<0.000000e+00> : vector<1xf32>
    %92 = vector.multi_reduction <add>, %91, %cst_34 [1, 2] : vector<1x48x128xf32> to vector<1xf32>
    %93 = vector.shape_cast %92 : vector<1xf32> to vector<1x1x1xf32>
    %94 = vector.extract %93[0, 0, 0] : f32 from vector<1x1x1xf32>
    %95 = vector.broadcast %94 : f32 to vector<1x8x128xf32>
    %c0_35 = arith.constant 0 : index
    %c0_36 = arith.constant 0 : index
    %c0_37 = arith.constant 0 : index
    %96 = vector.load %arg3[%c0_35, %c0_36, %c0_37] : memref<1x8x128xf32, #tpu.memory_space<vmem>>, vector<1x8x128xf32>
    tpu.vector_store %arg3[%c0_35, %c0_36, %c0_37], %95 {strides = array<i32>} : memref<1x8x128xf32, #tpu.memory_space<vmem>>, vector<1x8x128xf32>,
    return
  }
  func.func @transform_0(%arg0: i32) -> (i32, i32) {
    %c0_i32 = arith.constant 0 : i32
    %c0_i32_0 = arith.constant 0 : i32
    return %arg0, %c0_i32 : i32, i32
  }
  func.func @transform_1(%arg0: i32) -> (i32, i32) {
    %c0_i32 = arith.constant 0 : i32
    %c0_i32_0 = arith.constant 0 : i32
    return %arg0, %c0_i32 : i32, i32
  }
  func.func @transform_2(%arg0: i32) -> (i32, i32, i32) {
    %c0_i32 = arith.constant 0 : i32
    %c0_i32_0 = arith.constant 0 : i32
    %c0_i32_1 = arith.constant 0 : i32
    return %arg0, %c0_i32, %c0_i32_0 : i32, i32, i32
  }
}

</mosaic_0001>

<bundles_post_ra>
// kernel: gradient_difference_loss.1
= control target key start
LH: loop header
LB: loop body
LE: loop exit
PB: predicated region body
PF: predicated region fallthrough
CT: control target
= control target key end

     0   :  { %7 = vsyncpa [#allocation3], 0  ;;  %s1584_s0 = inlined_call_operand.hbm [shape: f32[96,128], index: 0, kind: input, shape index: {}]   ;;  %s1585_s1 = inlined_call_operand.hbm [shape: f32[96,128], index: 1, kind: input, shape index: {}]   ;;  %s1586_s2 = inlined_call_operand.vmem [shape: f32[2,8,128], index: 2, kind: output, shape index: {}]  }
   0x1   :  { %9 = vsyncpa [#allocation3 + $0x1], 0 }
   0x2   :  { %10 = vsyncpa [#allocation5], 0 }
   0x3   :  { %12 = vsyncpa [#allocation5 + $0x1], 0  ;;  %s956_s9 = smov 0   ;;  %s958_s10 = smov 0  }
   0x4   :  { %s960_s11 = smov 0   ;;  %s962_s12 = smov 0  }
   0x5 LB: > { %s975_s13 = sadd.s32 4294967295, %s933_s12   ;;  %s978_s14 = sadd.s32 1, %s933_s12   ;;  %s933_s12 = sphi %s962_s12, %s1604_s12   ;;  %s929_s11 = sphi %s960_s11, %s1603_s11   ;;  %s925_s10 = sphi %s958_s10, %s1602_s10   ;;  %s921_s9 = sphi %s956_s9, %s1601_s9  }
   0x6   : > { %s22_s15 = ssub.s32 %s933_s12, %s978_s14  ;;  %s25_s16 = sadd.s32 1, %s929_s11 }
   0x7   : > { %p23_p0 = scmp.eq.s32.totalorder %s22_s15, 0  ;;  %p32_p1 = scmp.ne.s32.totalorder %s929_s11, %s925_s10 }
   0x8   : > { %p33_p2 = scmp.eq.s32.totalorder %s933_s12, 0  ;;  %p38_p3 = scmp.ne.s32.totalorder %s925_s10, %s921_s9 }
   0x9   : > { %s988_s17 = scalar_select %p23_p0, %s929_s11, %s25_s16  }
   0xa   : > { %p34_p4 = por %p33_p2, %p32_p1  ;;  %p39_p5 = scmp.eq.s32.totalorder %s975_s13, 0 }
   0xb   : > { %p798_p6 = scmp.lt.s32.totalorder %s933_s12, 2  ;;  %s997_s19 = sand.u32 1, %s929_s11  }
   0xc   : > { %p992_p7 = por %p39_p5, %p38_p3  ;;  %s782_s20 = smul.u32 48, %s997_s19 }
   0xd   : > { %s780_s21 = smul.u32 768, %s933_s12  ;;  %p1001_p8 = pnand %p798_p6, %p34_p4 }
   0xe   : > { %s1588_s18 = scalar_select %p992_p7, 1, 0 }
   0xf   : > { %s1010_s25 = scalar_lea.hbm %s1584_s0, %s780_s21  ;;  %s118_s26 = scalar_lea.vmem [#allocation2], %s782_s20 }
  0x10   : > { %s125_s27 = sshll.u32 %s118_s26, 4  ;;  %s115_s28 = scalar_lea.sflag [#allocation3], %s997_s19  ;;  %s1014_s27 = int_to_ptr.vmem [resolvable:$true] %s125_s27 }
  0x11   : > { %s835_s29 = scalar_lea.hbm %s1010_s25, 768  ;;  %p837_p11 = pneg %p1001_p8 }
  0x12   : > { %p836_p10 = scmp.ne.s32.totalorder %s1010_s25, %s835_s29  ;;  %s840_s4 = scalar_lea.hbm %s1584_s0, 1536 }
  0x13   : > { %p841_p0 = scmp.lt.u32.totalorder %s1010_s25, %s1584_s0  ;;  %p842_p1 = scmp.lt.u32.totalorder %s840_s4, %s835_s29 }
  0x14   : > { %p838_p12 = pnand %p837_p11, %p836_p10  ;;  %p844_p3 = scmp.lt.u32.totalorder %s835_s29, %s1010_s25 }
  0x15   : > { %p843_p2 = por %p842_p1, %p841_p0 }
  0x16   : > { %p839_p13 = pneg %p838_p12 }
  0x17   : > { %p845_p4 = por %p844_p3, %p843_p2 }
  0x19   : > { %p846_p5 = pnand %p845_p4, %p839_p13 }
  0x1b   : > { %849 = shalt.err (!%p846_p5)
}
  0x1c   : > { %s850_s7 = scalar_lea.vmem %s1014_s27, 768  ;;  %s935_s8 = smov [#allocation2]  }
  0x1d   : > { %p851_p6 = scmp.ne.s32.totalorder %s1014_s27, %s850_s7  ;;  %s855_s9 = sshll.u32 %s935_s8, 4  ;;  %s856_s9 = int_to_ptr.vmem [resolvable:$false] %s855_s9 }
  0x1e   : > { %s857_s15 = scalar_lea.vmem %s856_s9, 1536  ;;  %p858_p9 = scmp.lt.s32.totalorder %s1014_s27, %s856_s9 }
  0x1f   : > { %p853_p10 = pnand %p851_p6, %p837_p11  ;;  %p859_p0 = scmp.lt.s32.totalorder %s857_s15, %s850_s7 }
  0x21   : > { %p854_p12 = pneg %p853_p10  ;;  %p860_p1 = por %p859_p0, %p858_p9 }
  0x23   : > { %p861_p2 = pnand %p860_p1, %p854_p12 }
  0x25   : > { %864 = shalt.err (!%p861_p2)
}
  0x26   : > { %s936_s16 = smov 128   ;;  %s937_s23 = smov 8  }
  0x27   : > { %794 = dma.hbm_to_vmem [thread:$0]  (!%p1001_p8), %s1010_s25, 768, %s1014_s27, %s115_s28, %s936_s16, %s936_s16, %s937_s23  }
  0x28   : > { %p154_p9 = scmp.lt.s32.totalorder %s933_s12, 3  ;;  %s1054_s29 = scalar_lea.hbm %s1585_s1, %s780_s21 }
  0x29   : > { %p1590_p13 = scmp.ge.s32.totalorder %s933_s12, 1  ;;  %s139_s3 = scalar_lea.vmem [#allocation4], %s782_s20 }
  0x2a   : > { %s146_s4 = sshll.u32 %s139_s3, 4  ;;  %s136_s25 = scalar_lea.sflag [#allocation5], %s997_s19  ;;  %s1064_s4 = int_to_ptr.vmem [resolvable:$true] %s146_s4 }
  0x2b   : > { %p1058_p3 = pnand %p1590_p13, %p154_p9  ;;  %s865_s27 = scalar_lea.hbm %s1054_s29, 768 }
  0x2c   : > { %p866_p4 = scmp.ne.s32.totalorder %s1054_s29, %s865_s27  ;;  %s870_s28 = scalar_lea.hbm %s1585_s1, 1536 }
  0x2d   : > { %p871_p10 = scmp.lt.u32.totalorder %s1054_s29, %s1585_s1  ;;  %p872_p12 = scmp.lt.u32.totalorder %s870_s28, %s865_s27 }
  0x2e   : > { %p868_p5 = pnand %p866_p4, %p837_p11  ;;  %p874_p1 = scmp.lt.u32.totalorder %s865_s27, %s1054_s29 }
  0x2f   : > { %p873_p0 = por %p872_p12, %p871_p10 }
  0x30   : > { %p869_p6 = pneg %p868_p5 }
  0x31   : > { %p875_p2 = por %p874_p1, %p873_p0 }
  0x33   : > { %p876_p9 = pnand %p875_p2, %p869_p6 }
  0x35   : > { %879 = shalt.err (!%p876_p9)
}
  0x36   : > { %s880_s20 = scalar_lea.vmem %s1064_s4, 768  ;;  %s938_s7 = smov [#allocation4]  }
  0x37   : > { %p881_p13 = scmp.ne.s32.totalorder %s1064_s4, %s880_s20  ;;  %s885_s8 = sshll.u32 %s938_s7, 4  ;;  %s886_s8 = int_to_ptr.vmem [resolvable:$false] %s885_s8 }
  0x38   : > { %s887_s9 = scalar_lea.vmem %s886_s8, 1536  ;;  %p888_p7 = scmp.lt.s32.totalorder %s1064_s4, %s886_s8 }
  0x39   : > { %p883_p4 = pnand %p881_p13, %p837_p11  ;;  %p889_p10 = scmp.lt.s32.totalorder %s887_s9, %s880_s20 }
  0x3b   : > { %p884_p5 = pneg %p883_p4  ;;  %p890_p12 = por %p889_p10, %p888_p7 }
  0x3d   : > { %p891_p0 = pnand %p890_p12, %p884_p5 }
  0x3f   : > { %894 = shalt.err (!%p891_p0)
}
  0x40   : > { %797 = dma.hbm_to_vmem [thread:$0]  (!%p1001_p8), %s1054_s29, 768, %s1064_s4, %s136_s25, %s936_s16, %s936_s16, %s937_s23  }
  0x41   : > { %158 = sbr.rel (%p1058_p3) target bundleno = 509 (0x1fd), region = 28  ;;  %s160_s15 = sand.u32 (!%p1058_p3), 1, %s925_s10  }
  0x42   : > { %s784_s24 = smul.u32 (!%p1058_p3), 48, %s160_s15  ;;  %s161_s26 = scalar_lea.sflag (!%p1058_p3), [#allocation3], %s160_s15 }
  0x43   : > { %p1592_p7 = scmp.ne.s32.totalorder (!%p1058_p3), %s1588_s18, 0 }
  0x44   : > { %s1098_s3 = scalar_lea.vmem (!%p1058_p3), [#allocation2], %s784_s24 }
  0x48   : > { %912 = dma.done.wait (%p1592_p7), %s161_s26, 768  }
  0x49   : > { %914 = vsyncadd (%p1592_p7), %s161_s26, 4294966528  ;;  %s170_s19 = scalar_lea.sflag [#allocation5], %s160_s15  ;;  %s1104_s22 = scalar_lea.vmem [#allocation4], %s784_s24 }
  0x4a   : > { %916 = dma.done.wait (%p1592_p7), %s170_s19, 768  }
  0x4b   : > { %918 = vsyncadd (%p1592_p7), %s170_s19, 4294966528  ;;  %v204_v0 = vlaneseq  ;;  %v1122_v5 = vld [vmem:[%s1104_s22] sm:$0xff]  ;;  %v300_v6 = vld [vmem:[%s1104_s22 + $0x8] sm:$0xff]  ;;  %s939_s18 = smov 1   ;;  %s940_s16 = smov 127  }
  0x4c   : > { %v1126_v7 = vld [vmem:[%s1104_s22 + $0x28] sm:$0xff]  ;;  %v305_v10 = vrot.slane %v1122_v5, 7  ;;  %v324_v12 = vrot.slane %v1122_v5, 1  ;;  %v325_v13 = vrot.slane %v300_v6, 1  ;;  %v1133_v14 = vld [vmem:[%s1104_s22 + $0x10] sm:$0xff]  ;;  %v1136_v15 = vld [vmem:[%s1098_s3] sm:$0xff] }
  0x4d   : > { %v1111_v1 = vshrl.u32 %v204_v0, 7  ;;  %v310_v11 = vrot.slane %v1126_v7, 7  ;;  %v306_v17 = vrot.slane %v300_v6, 7  ;;  %v326_v18 = vrot.slane %v1133_v14, 1  ;;  %v1144_v19 = vld [vmem:[%s1098_s3 + $0x8] sm:$0xff]  ;;  %v1168_v30 = vld [vmem:[%s1098_s3 + $0x10] sm:$0xff] }
  0x4e   : > { %v1147_v20 = vld [vmem:[%s1098_s3 + $0x28] sm:$0xff]  ;;  %v481_v21 = vrot.slane %v1136_v15, 7  ;;  %v499_v25 = vrot.slane %v1136_v15, 1  ;;  %v500_v29 = vrot.slane %v1144_v19, 1  ;;  %v482_v37 = vrot.slane %v1144_v19, 7  ;;  %v1203_v44 = vld [vmem:[%s1104_s22 + $0x18] sm:$0xff] }
  0x4f   : > { %v215_v2 = vand.u32 15, %v1111_v1  ;;  %v206_v3 = vadd.s32 8, %v1111_v1  ;;  %vm311_vm0 = vcmp.lt.s32.totalorder %v1111_v1, 1  ;;  %vm330_vm1 = vcmp.lt.s32.totalorder %v1111_v1, 7  ;;  %v1227_v53 = vld [vmem:[%s1098_s3 + $0x20] sm:$0xff]  ;;  %v1238_v57 = vld [vmem:[%s1098_s3 + $0x18] sm:$0xff] }
  0x50   : > { %v207_v9 = vadd.s32 16, %v1111_v1  ;;  %v317_v22 = vsel %vm311_vm0, %v310_v11, %v305_v10  ;;  %v335_v23 = vsel %vm330_vm1, %v324_v12, %v325_v13  ;;  %v486_v24 = vrot.slane %v1147_v20, 7  ;;  %v1250_v63 = vld [vmem:[%s1104_s22 + $0x20] sm:$0xff]  ;;  %p200_p8 = scmp.lt.s32.totalorder %s975_s13, 1 }
  0x51   : > { %vm1117_vm2 = vcmp.ne.s32.totalorder %v215_v2, 0  ;;  %v222_v8 = vand.u32 15, %v206_v3  ;;  %v316_v27 = vsel %vm311_vm0, %v305_v10, %v306_v17  ;;  %v334_v28 = vsel %vm330_vm1, %v325_v13, %v326_v18 }
  0x52   : > { %v318_v26 = vsel %vm1117_vm2, %v317_v22, 0.0  ;;  %v492_v34 = vsel %vm311_vm0, %v486_v24, %v481_v21  ;;  %v501_v38 = vrot.slane %v1168_v30, 1  ;;  %v509_v40 = vsel %vm330_vm1, %v499_v25, %v500_v29  ;;  %s1606_s13 = smov (!%p200_p8, %s975_s13), 1 }
  0x53   : > { %vm1138_vm3 = vcmp.ne.s32.totalorder %v222_v8, 15  ;;  %v1170_v31 = vsub.f32 %v318_v26, %v335_v23  ;;  %v1172_v32 = vadd.f32 %v335_v23, %v318_v26  ;;  %v493_v39 = vsel %vm1117_vm2, %v492_v34, 0.0  ;;  %s777_s23 = sshll.u32 %s1606_s13, 3 }
  0x54   : > { %v338_v33 = vsel %vm1138_vm3, %v334_v28, 0.0  ;;  %v491_v41 = vsel %vm311_vm0, %v481_v21, %v482_v37  ;;  %v508_v42 = vsel %vm330_vm1, %v500_v29, %v501_v38  ;;  %v229_v43 = vand.u32 15, %v207_v9  ;;  %s203_s4 = scalar_lea.vmem %s1586_s2, %s777_s23 }
  0x55   : > { %355 = vrot.lane.b32.xlu0 %v1170_v31, %s939_s18  ;;  %409 = vrot.lane.b32.xlu1 %v1172_v32, %s939_s18  ;;  %v1182_v35 = vsub.f32 %v316_v27, %v338_v33  ;;  %v1184_v36 = vadd.f32 %v338_v33, %v316_v27  ;;  %v307_v45 = vrot.slane %v1133_v14, 7  ;;  %v512_v46 = vsel %vm1138_vm3, %v508_v42, 0.0 }
  0x56   : > { %v209_v47 = vadd.s32 32, %v1111_v1  ;;  %v1213_v48 = vsub.f32 %v493_v39, %v509_v40  ;;  %v1215_v49 = vsub.f32 %v491_v41, %v512_v46  ;;  %v327_v50 = vrot.slane %v1203_v44, 1 }
  0x57   : > { %vm1218_vm4 = vcmp.ne.s32.totalorder %v229_v43, 0  ;;  %v315_v52 = vsel %vm311_vm0, %v306_v17, %v307_v45  ;;  %v1233_v55 = vadd.f32 %v509_v40, %v493_v39  ;;  %v1235_v56 = vadd.f32 %v512_v46, %v491_v41 }
  0x58   : > { %v243_v54 = vand.u32 15, %v209_v47  ;;  %v485_v58 = vrot.slane %v1227_v53, 7  ;;  %v320_v59 = vsel %vm1218_vm4, %v315_v52, 0.0  ;;  %v333_v60 = vsel %vm330_vm1, %v326_v18, %v327_v50 }
  0x59   : > { %357 = vrot.lane.b32.xlu0 %v1182_v35, %s939_s18  ;;  %411 = vrot.lane.b32.xlu1 %v1184_v36, %s939_s18  ;;  %v484_v61 = vrot.slane %v1238_v57, 7  ;;  %v210_v62 = vadd.s32 40, %v1111_v1  ;;  %v309_v3 = vrot.slane %v1250_v63, 7  ;;  %v329_v4 = vrot.slane %v1126_v7, 1 }
  0x5a   : > { %vm1252_vm5 = vcmp.ne.s32.totalorder %v243_v54, 0  ;;  %v1266_v8 = vsub.f32 %v320_v59, %v333_v60  ;;  %v503_v9 = vrot.slane %v1227_v53, 1  ;;  %v504_v13 = vrot.slane %v1147_v20, 1 }
  0x5b   : > { %v488_v6 = vsel %vm311_vm0, %v484_v61, %v485_v58  ;;  %v250_v16 = vand.u32 15, %v210_v62  ;;  %v312_v17 = vsel %vm311_vm0, %v309_v3, %v310_v11  ;;  %v336_v18 = vsel %vm330_vm1, %v329_v4, %v324_v12 }
  0x5c   : > { %v497_v10 = vsel %vm1252_vm5, %v488_v6, 0.0  ;;  %v487_v21 = vsel %vm311_vm0, %v485_v58, %v486_v24  ;;  %v483_v20 = vrot.slane %v1168_v30, 7  ;;  %v505_v22 = vsel %vm330_vm1, %v503_v9, %v504_v13 }
  0x5d   : > { %529 = vrot.lane.b32.xlu0 %v1213_v48, %s939_s18  ;;  %531 = vrot.lane.b32.xlu1 %v1215_v49, %s939_s18  ;;  %v510_v11 = vsel %vm330_vm1, %v504_v13, %v499_v25  ;;  %v1293_v23 = vsub.f32 %v497_v10, %v505_v22  ;;  %v1295_v5 = vadd.f32 %v505_v22, %v497_v10  ;;  %vm296_vm6 = vcmp.ne.s32.totalorder %v250_v16, 15 }
  0x5e   : > { %v1301_v12 = vadd.f32 %v333_v60, %v320_v59  ;;  %v502_v24 = vrot.slane %v1238_v57, 1  ;;  %v342_v15 = vsel %vm296_vm6, %v336_v18, 0.0  ;;  %v516_v26 = vsel %vm296_vm6, %v510_v11, 0.0 }
  0x5f   : > { %v1304_v27 = vsub.f32 %v312_v17, %v342_v15  ;;  %v1306_v25 = vadd.f32 %v342_v15, %v312_v17  ;;  %v1308_v28 = vsub.f32 %v487_v21, %v516_v26  ;;  %v1310_v29 = vadd.f32 %v516_v26, %v487_v21 }
  0x60   : > { %v490_v33 = vsel %vm311_vm0, %v482_v37, %v483_v20  ;;  %v507_v39 = vsel %vm330_vm1, %v501_v38, %v502_v24  ;;  %v208_v40 = vadd.s32 24, %v1111_v1  ;;  %v328_v41 = vrot.slane %v1250_v63, 1 }
  0x61   : > { %583 = vrot.lane.b32.xlu0 %v1233_v55, %s939_s18  ;;  %585 = vrot.lane.b32.xlu1 %v1235_v56, %s939_s18  ;;  %v495_v34 = vsel %vm1218_vm4, %v490_v33, 0.0  ;;  %v308_v38 = vrot.slane %v1203_v44, 7  ;;  %v506_v47 = vsel %vm330_vm1, %v502_v24, %v503_v9  ;;  %v1442_v1 = vand.u32 127, %v204_v0 }
  0x62   : > { %v1331_v19 = vsub.f32 %v495_v34, %v507_v39  ;;  %v236_v37 = vand.u32 15, %v208_v40  ;;  %v1338_v30 = vadd.f32 %v507_v39, %v495_v34  ;;  %v332_v42 = vsel %vm330_vm1, %v327_v50, %v328_v41 }
  0x63   : > { %v314_v43 = vsel %vm311_vm0, %v307_v45, %v308_v38  ;;  %v489_v45 = vsel %vm311_vm0, %v483_v20, %v484_v61  ;;  %v313_v52 = vsel %vm311_vm0, %v308_v38, %v309_v3  ;;  %v331_v57 = vsel %vm330_vm1, %v328_v41, %v329_v4 }
  0x64   : > { %vm294_vm7 = vcmp.ne.s32.totalorder %v236_v37, 15  ;;  %v322_v54 = vsel %vm1252_vm5, %v313_v52, 0.0  ;;  %vm297_vm8 = vcmp.ne.s32.totalorder %v1442_v1, 0  ;;  %v373_v7 = vmul.f32 2.0, %v1170_v31 }
  0x65   : > { %359 = vrot.lane.b32.xlu0 %v1266_v8, %s939_s18  ;;  %385 = vrot.lane.b32.xlu1 %v1170_v31, %s940_s16  ;;  %v340_v46 = vsel %vm294_vm7, %v332_v42, 0.0  ;;  %v514_v50 = vsel %vm294_vm7, %v506_v47, 0.0  ;;  %v1397_v58 = vsub.f32 %v322_v54, %v331_v57  ;;  %v1403_v59 = vadd.f32 %v331_v57, %v322_v54 }
  0x66   : > { %v1357_v44 = vsub.f32 %v314_v43, %v340_v46  ;;  %v1365_v14 = vadd.f32 %v340_v46, %v314_v43  ;;  %v1375_v51 = vsub.f32 %v489_v45, %v514_v50  ;;  %v1385_v53 = vadd.f32 %v514_v50, %v489_v45 }
  0x67   : > { %v427_v60 = vmul.f32 2.0, %v1172_v32  ;;  %v374_v6 = vmul.f32 2.0, %v1182_v35  ;;  %v428_v0 = vmul.f32 2.0, %v1184_v36  ;;  %v547_v17 = vmul.f32 2.0, %v1213_v48 }
  0x68   : > { %v548_v18 = vmul.f32 2.0, %v1215_v49  ;;  %v601_v24 = vmul.f32 2.0, %v1233_v55  ;;  %v602_v15 = vmul.f32 2.0, %v1235_v56  ;;  %vm298_vm9 = vcmp.ne.s32.totalorder %v1442_v1, 127 }
  0x69   : > { %387 = vrot.lane.b32.xlu0 %v1182_v35, %s940_s16  ;;  %413 = vrot.lane.b32.xlu1 %v1301_v12, %s939_s18  ;;  %v375_v40 = vmul.f32 2.0, %v1266_v8  ;;  %v429_v43 = vmul.f32 2.0, %v1301_v12 }
  0x6d   : > { %439 = vrot.lane.b32.xlu0 %v1172_v32, %s940_s16  ;;  %441 = vrot.lane.b32.xlu1 %v1184_v36, %s940_s16 }
  0x71   : > { %533 = vrot.lane.b32.xlu0 %v1331_v19, %s939_s18  ;;  %559 = vrot.lane.b32.xlu1 %v1213_v48, %s940_s16 }
  0x75   : > { %561 = vrot.lane.b32.xlu0 %v1215_v49, %s940_s16  ;;  %587 = vrot.lane.b32.xlu1 %v1338_v30, %s939_s18 }
  0x79   : > { %613 = vrot.lane.b32.xlu0 %v1233_v55, %s940_s16  ;;  %615 = vrot.lane.b32.xlu1 %v1235_v56, %s940_s16 }
  0x7d   : > { %361 = vrot.lane.b32.xlu0 %v1357_v44, %s939_s18  ;;  %389 = vrot.lane.b32.xlu1 %v1266_v8, %s940_s16 }
  0x81   : > { %415 = vrot.lane.b32.xlu0 %v1365_v14, %s939_s18  ;;  %443 = vrot.lane.b32.xlu1 %v1301_v12, %s940_s16 }
  0x85   : > { %535 = vrot.lane.b32.xlu0 %v1375_v51, %s939_s18  ;;  %563 = vrot.lane.b32.xlu1 %v1331_v19, %s940_s16 }
  0x89   : > { %589 = vrot.lane.b32.xlu0 %v1385_v53, %s939_s18  ;;  %617 = vrot.lane.b32.xlu1 %v1338_v30, %s940_s16 }
  0x8d   : > { %363 = vrot.lane.b32.xlu0 %v1397_v58, %s939_s18  ;;  %391 = vrot.lane.b32.xlu1 %v1357_v44, %s940_s16 }
  0x91   : > { %417 = vrot.lane.b32.xlu0 %v1403_v59, %s939_s18  ;;  %445 = vrot.lane.b32.xlu1 %v1365_v14, %s940_s16 }
  0x95   : > { %537 = vrot.lane.b32.xlu0 %v1293_v23, %s939_s18  ;;  %565 = vrot.lane.b32.xlu1 %v1375_v51, %s940_s16 }
  0x99   : > { %591 = vrot.lane.b32.xlu0 %v1295_v5, %s939_s18  ;;  %619 = vrot.lane.b32.xlu1 %v1385_v53, %s940_s16 }
  0x9d   : > { %365 = vrot.lane.b32.xlu0 %v1304_v27, %s939_s18  ;;  %393 = vrot.lane.b32.xlu1 %v1397_v58, %s940_s16 }
  0xa1   : > { %419 = vrot.lane.b32.xlu0 %v1306_v25, %s939_s18  ;;  %447 = vrot.lane.b32.xlu1 %v1403_v59, %s940_s16 }
  0xa5   : > { %539 = vrot.lane.b32.xlu0 %v1308_v28, %s939_s18  ;;  %567 = vrot.lane.b32.xlu1 %v1293_v23, %s940_s16 }
  0xa9   : > { %593 = vrot.lane.b32.xlu0 %v1310_v29, %s939_s18  ;;  %621 = vrot.lane.b32.xlu1 %v1295_v5, %s940_s16 }
  0xad   : > { %395 = vrot.lane.b32.xlu0 %v1304_v27, %s940_s16  ;;  %449 = vrot.lane.b32.xlu1 %v1306_v25, %s940_s16 }
  0xb1   : > { %569 = vrot.lane.b32.xlu0 %v1308_v28, %s940_s16  ;;  %623 = vrot.lane.b32.xlu1 %v1310_v29, %s940_s16 }
  0xc7   : > { %v356_v61 = vpop.permute.xlu0 %355  ;;  %v410_v62 = vpop.permute.xlu1 %409 }
  0xc8   : > { %v367_v63 = vsel %vm297_vm8, %v356_v61, 0.0  ;;  %v421_v2 = vsel %vm297_vm8, %v410_v62, 0.0  ;;  %v549_v62 = vmul.f32 2.0, %v1331_v19 }
  0xc9   : > { %v379_v3 = vadd.f32 %v373_v7, %v367_v63  ;;  %v433_v4 = vadd.f32 %v427_v60, %v421_v2 }
  0xcb   : > { %v358_v9 = vpop.permute.xlu0 %357  ;;  %v412_v10 = vpop.permute.xlu1 %411 }
  0xcc   : > { %v368_v31 = vsel %vm297_vm8, %v358_v9, 0.0  ;;  %v422_v32 = vsel %vm297_vm8, %v412_v10, 0.0 }
  0xcd   : > { %v380_v13 = vadd.f32 %v374_v6, %v368_v31  ;;  %v434_v16 = vadd.f32 %v428_v0, %v422_v32  ;;  %v603_v32 = vmul.f32 2.0, %v1338_v30 }
  0xcf   : > { %v530_v21 = vpop.permute.xlu0 %529  ;;  %v532_v20 = vpop.permute.xlu1 %531 }
  0xd0   : > { %v541_v35 = vsel %vm297_vm8, %v530_v21, 0.0  ;;  %v542_v36 = vsel %vm297_vm8, %v532_v20, 0.0 }
  0xd1   : > { %v553_v22 = vadd.f32 %v547_v17, %v541_v35  ;;  %v554_v11 = vadd.f32 %v548_v18, %v542_v36 }
  0xd3   : > { %v584_v26 = vpop.permute.xlu0 %583  ;;  %v586_v33 = vpop.permute.xlu1 %585 }
  0xd4   : > { %v595_v48 = vsel %vm297_vm8, %v584_v26, 0.0  ;;  %v596_v49 = vsel %vm297_vm8, %v586_v33, 0.0 }
  0xd5   : > { %v607_v34 = vadd.f32 %v601_v24, %v595_v48  ;;  %v608_v39 = vadd.f32 %v602_v15, %v596_v49  ;;  %v376_v48 = vmul.f32 2.0, %v1357_v44 }
  0xd7   : > { %v360_v37 = vpop.permute.xlu0 %359  ;;  %v386_v41 = vpop.permute.xlu1 %385 }
  0xd8   : > { %v369_v55 = vsel %vm297_vm8, %v360_v37, 0.0  ;;  %v397_v56 = vsel %vm298_vm9, %v386_v41, 0.0 }
  0xd9   : > { %v381_v38 = vadd.f32 %v375_v40, %v369_v55  ;;  %v403_v42 = vadd.f32 %v397_v56, %v379_v3 }
  0xdb   : > { %v388_v46 = vpop.permute.xlu0 %387  ;;  %v414_v47 = vpop.permute.xlu1 %413  ;;  %v463_v63 = vand.u32 2147483647, %v403_v42 }
  0xdc   : > { %v398_v45 = vsel %vm298_vm9, %v388_v46, 0.0  ;;  %v423_v8 = vsel %vm297_vm8, %v414_v47, 0.0 }
  0xdd   : > { %v404_v50 = vadd.f32 %v398_v45, %v380_v13  ;;  %v435_v52 = vadd.f32 %v429_v43, %v423_v8  ;;  %v430_v43 = vmul.f32 2.0, %v1365_v14 }
  0xdf   : > { %v440_v54 = vpop.permute.xlu0 %439  ;;  %v442_v57 = vpop.permute.xlu1 %441  ;;  %v464_v2 = vand.u32 2147483647, %v404_v50 }
  0xe0   : > { %v451_v7 = vsel %vm298_vm9, %v440_v54, 0.0  ;;  %v452_v60 = vsel %vm298_vm9, %v442_v57, 0.0 }
  0xe1   : > { %v457_v61 = vsub.f32 %v433_v4, %v451_v7  ;;  %v458_v12 = vsub.f32 %v434_v16, %v452_v60 }
  0xe3   : > { %v469_v3 = vand.u32 2147483647, %v457_v61  ;;  %v470_v6 = vand.u32 2147483647, %v458_v12  ;;  %v534_v0 = vpop.permute.xlu0 %533  ;;  %v560_v9 = vpop.permute.xlu1 %559  ;;  %v550_v12 = vmul.f32 2.0, %v1375_v51 }
  0xe4   : > { %v543_v10 = vsel %vm297_vm8, %v534_v0, 0.0  ;;  %v571_v31 = vsel %vm298_vm9, %v560_v9, 0.0 }
  0xe5   : > { %v649_v13 = vadd.f32 %v469_v3, %v463_v63  ;;  %v650_v17 = vadd.f32 %v470_v6, %v464_v2  ;;  %v555_v4 = vadd.f32 %v549_v62, %v543_v10  ;;  %v577_v16 = vadd.f32 %v571_v31, %v553_v22 }
  0xe6   : > { %v604_v10 = vmul.f32 2.0, %v1385_v53 }
  0xe7   : > { %v562_v18 = vpop.permute.xlu0 %561  ;;  %v588_v19 = vpop.permute.xlu1 %587  ;;  %v637_v49 = vand.u32 2147483647, %v577_v16  ;;  %v377_v16 = vmul.f32 2.0, %v1397_v58 }
  0xe8   : > { %v572_v21 = vsel %vm298_vm9, %v562_v18, 0.0  ;;  %v597_v20 = vsel %vm297_vm8, %v588_v19, 0.0 }
  0xe9   : > { %v578_v35 = vadd.f32 %v572_v21, %v554_v11  ;;  %v609_v36 = vadd.f32 %v603_v32, %v597_v20 }
  0xeb   : > { %v614_v24 = vpop.permute.xlu0 %613  ;;  %v616_v15 = vpop.permute.xlu1 %615  ;;  %v638_v40 = vand.u32 2147483647, %v578_v35 }
  0xec   : > { %v625_v26 = vsel %vm298_vm9, %v614_v24, 0.0  ;;  %v626_v30 = vsel %vm298_vm9, %v616_v15, 0.0 }
  0xed   : > { %v631_v33 = vsub.f32 %v607_v34, %v625_v26  ;;  %v632_v22 = vsub.f32 %v608_v39, %v626_v30  ;;  %v431_v26 = vmul.f32 2.0, %v1403_v59 }
  0xef   : > { %v643_v37 = vand.u32 2147483647, %v631_v33  ;;  %v644_v41 = vand.u32 2147483647, %v632_v22  ;;  %v362_v55 = vpop.permute.xlu0 %361  ;;  %v390_v56 = vpop.permute.xlu1 %389 }
  0xf0   : > { %v370_v11 = vsel %vm297_vm8, %v362_v55, 0.0  ;;  %v399_v42 = vsel %vm298_vm9, %v390_v56, 0.0 }
  0xf1   : > { %v655_v46 = vadd.f32 %v643_v37, %v637_v49  ;;  %v656_v47 = vadd.f32 %v644_v41, %v638_v40  ;;  %v382_v34 = vadd.f32 %v376_v48, %v370_v11  ;;  %v405_v39 = vadd.f32 %v399_v42, %v381_v38 }
  0xf2   : > { %v551_v40 = vmul.f32 2.0, %v1293_v23 }
  0xf3   : > { %v661_v45 = vsub.f32 %v649_v13, %v655_v46  ;;  %v662_v44 = vsub.f32 %v650_v17, %v656_v47  ;;  %v416_v8 = vpop.permute.xlu0 %415  ;;  %v444_v50 = vpop.permute.xlu1 %443  ;;  %v465_v14 = vand.u32 2147483647, %v405_v39 }
  0xf4   : > { %v424_v54 = vsel %vm297_vm8, %v416_v8, 0.0  ;;  %v453_v57 = vsel %vm298_vm9, %v444_v50, 0.0 }
  0xf5   : > { %v667_v7 = vadd.f32 %v662_v44, %v661_v45  ;;  %v436_v60 = vadd.f32 %v430_v43, %v424_v54  ;;  %v459_v61 = vsub.f32 %v435_v52, %v453_v57  ;;  %v378_v54 = vmul.f32 2.0, %v1304_v27 }
  0xf7   : > { %v471_v62 = vand.u32 2147483647, %v459_v61  ;;  %v536_v63 = vpop.permute.xlu0 %535  ;;  %v564_v2 = vpop.permute.xlu1 %563 }
  0xf8   : > { %v544_v38 = vsel %vm297_vm8, %v536_v63, 0.0  ;;  %v573_v3 = vsel %vm298_vm9, %v564_v2, 0.0  ;;  %v432_v2 = vmul.f32 2.0, %v1306_v25 }
  0xf9   : > { %v651_v6 = vadd.f32 %v471_v62, %v465_v14  ;;  %v556_v0 = vadd.f32 %v550_v12, %v544_v38  ;;  %v579_v9 = vadd.f32 %v573_v3, %v555_v4 }
  0xfb   : > { %v590_v31 = vpop.permute.xlu0 %589  ;;  %v618_v32 = vpop.permute.xlu1 %617  ;;  %v639_v18 = vand.u32 2147483647, %v579_v9 }
  0xfc   : > { %v598_v51 = vsel %vm297_vm8, %v590_v31, 0.0  ;;  %v627_v52 = vsel %vm298_vm9, %v618_v32, 0.0  ;;  %v552_v31 = vmul.f32 2.0, %v1308_v28 }
  0xfd   : > { %v610_v13 = vadd.f32 %v604_v10, %v598_v51  ;;  %v633_v17 = vsub.f32 %v609_v36, %v627_v52 }
  0xff   : > { %v645_v19 = vand.u32 2147483647, %v633_v17  ;;  %v364_v21 = vpop.permute.xlu0 %363  ;;  %v392_v20 = vpop.permute.xlu1 %391 }
 0x100   : > { %v371_v4 = vsel %vm297_vm8, %v364_v21, 0.0  ;;  %v400_v53 = vsel %vm298_vm9, %v392_v20, 0.0  ;;  %v606_v20 = vmul.f32 2.0, %v1310_v29 }
 0x101   : > { %v657_v35 = vadd.f32 %v645_v19, %v639_v18  ;;  %v383_v24 = vadd.f32 %v377_v16, %v371_v4  ;;  %v406_v15 = vadd.f32 %v400_v53, %v382_v34  ;;  %v605_v34 = vmul.f32 2.0, %v1295_v5 }
 0x103   : > { %v663_v30 = vsub.f32 %v651_v6, %v657_v35  ;;  %v418_v33 = vpop.permute.xlu0 %417  ;;  %v446_v36 = vpop.permute.xlu1 %445  ;;  %v466_v41 = vand.u32 2147483647, %v406_v15 }
 0x104   : > { %v425_v58 = vsel %vm297_vm8, %v418_v33, 0.0  ;;  %v454_v22 = vsel %vm298_vm9, %v446_v36, 0.0 }
 0x105   : > { %v437_v48 = vadd.f32 %v431_v26, %v425_v58  ;;  %v460_v49 = vsub.f32 %v436_v60, %v454_v22  ;;  %v668_v37 = vadd.f32 %v667_v7, %v663_v30 }
 0x107   : > { %v472_v55 = vand.u32 2147483647, %v460_v49  ;;  %v538_v56 = vpop.permute.xlu0 %537  ;;  %v566_v11 = vpop.permute.xlu1 %565 }
 0x108   : > { %v545_v59 = vsel %vm297_vm8, %v538_v56, 0.0  ;;  %v574_v42 = vsel %vm298_vm9, %v566_v11, 0.0 }
 0x109   : > { %v652_v43 = vadd.f32 %v472_v55, %v466_v41  ;;  %v557_v46 = vadd.f32 %v551_v40, %v545_v59  ;;  %v580_v47 = vadd.f32 %v574_v42, %v556_v0 }
 0x10b   : > { %v592_v39 = vpop.permute.xlu0 %591  ;;  %v620_v45 = vpop.permute.xlu1 %619  ;;  %v640_v57 = vand.u32 2147483647, %v580_v47 }
 0x10c   : > { %v599_v23 = vsel %vm297_vm8, %v592_v39, 0.0  ;;  %v628_v44 = vsel %vm298_vm9, %v620_v45, 0.0 }
 0x10d   : > { %v611_v8 = vadd.f32 %v605_v34, %v599_v23  ;;  %v634_v50 = vsub.f32 %v610_v13, %v628_v44 }
 0x10f   : > { %v646_v7 = vand.u32 2147483647, %v634_v50  ;;  %v366_v60 = vpop.permute.xlu0 %365  ;;  %v394_v61 = vpop.permute.xlu1 %393 }
 0x110   : > { %v372_v12 = vsel %vm297_vm8, %v366_v60, 0.0  ;;  %v401_v5 = vsel %vm298_vm9, %v394_v61, 0.0 }
 0x111   : > { %v658_v14 = vadd.f32 %v646_v7, %v640_v57  ;;  %v384_v62 = vadd.f32 %v378_v54, %v372_v12  ;;  %v407_v63 = vadd.f32 %v401_v5, %v383_v24 }
 0x113   : > { %v664_v38 = vsub.f32 %v652_v43, %v658_v14  ;;  %v420_v3 = vpop.permute.xlu0 %419  ;;  %v448_v6 = vpop.permute.xlu1 %447  ;;  %v467_v51 = vand.u32 2147483647, %v407_v63 }
 0x114   : > { %v426_v27 = vsel %vm297_vm8, %v420_v3, 0.0  ;;  %v455_v0 = vsel %vm298_vm9, %v448_v6, 0.0 }
 0x115   : > { %v438_v9 = vadd.f32 %v432_v2, %v426_v27  ;;  %v461_v10 = vsub.f32 %v437_v48, %v455_v0  ;;  %v669_v32 = vadd.f32 %v668_v37, %v664_v38 }
 0x117   : > { %v473_v52 = vand.u32 2147483647, %v461_v10  ;;  %v540_v13 = vpop.permute.xlu0 %539  ;;  %v568_v17 = vpop.permute.xlu1 %567 }
 0x118   : > { %v546_v25 = vsel %vm297_vm8, %v540_v13, 0.0  ;;  %v575_v16 = vsel %vm298_vm9, %v568_v17, 0.0 }
 0x119   : > { %v653_v18 = vadd.f32 %v473_v52, %v467_v51  ;;  %v558_v19 = vadd.f32 %v552_v31, %v546_v25  ;;  %v581_v21 = vadd.f32 %v575_v16, %v557_v46 }
 0x11b   : > { %v594_v4 = vpop.permute.xlu0 %593  ;;  %v622_v53 = vpop.permute.xlu1 %621  ;;  %v641_v26 = vand.u32 2147483647, %v581_v21 }
 0x11c   : > { %v600_v28 = vsel %vm297_vm8, %v594_v4, 0.0  ;;  %v629_v35 = vsel %vm298_vm9, %v622_v53, 0.0 }
 0x11d   : > { %v612_v24 = vadd.f32 %v606_v20, %v600_v28  ;;  %v635_v15 = vsub.f32 %v611_v8, %v629_v35 }
 0x11f   : > { %v647_v30 = vand.u32 2147483647, %v635_v15  ;;  %v396_v33 = vpop.permute.xlu0 %395  ;;  %v450_v36 = vpop.permute.xlu1 %449 }
 0x120   : > { %v402_v58 = vsel %vm298_vm9, %v396_v33, 0.0  ;;  %v456_v29 = vsel %vm298_vm9, %v450_v36, 0.0 }
 0x121   : > { %v659_v22 = vadd.f32 %v647_v30, %v641_v26  ;;  %v408_v48 = vadd.f32 %v402_v58, %v384_v62  ;;  %v462_v49 = vsub.f32 %v438_v9, %v456_v29 }
 0x123   : > { %v468_v40 = vand.u32 2147483647, %v408_v48  ;;  %v474_v37 = vand.u32 2147483647, %v462_v49  ;;  %v570_v41 = vpop.permute.xlu0 %569  ;;  %v624_v55 = vpop.permute.xlu1 %623  ;;  %v665_v56 = vsub.f32 %v653_v18, %v659_v22 }
 0x124   : > { %v576_v11 = vsel %vm298_vm9, %v570_v41, 0.0  ;;  %v630_v59 = vsel %vm298_vm9, %v624_v55, 0.0 }
 0x125   : > { %v654_v42 = vadd.f32 %v474_v37, %v468_v40  ;;  %v582_v43 = vadd.f32 %v576_v11, %v558_v19  ;;  %v636_v46 = vsub.f32 %v612_v24, %v630_v59  ;;  %v670_v47 = vadd.f32 %v669_v32, %v665_v56 }
 0x127   : > { %v642_v34 = vand.u32 2147483647, %v582_v43  ;;  %v648_v39 = vand.u32 2147483647, %v636_v46 }
 0x129   : > { %v660_v45 = vadd.f32 %v648_v39, %v642_v34 }
 0x12b   : > { %v666_v23 = vsub.f32 %v654_v42, %v660_v45 }
 0x12d   : > { %v671_v44 = vadd.f32 %v670_v47, %v666_v23 }
 0x12f   : > { %672 = vadd.xlane.f32.xlu0 %v671_v44 }
 0x1bc   : > { %v673_v8 = vpop.xlane.xlu0 %672 }
 0x1bd   : > { %v674_v50 = vrot.slane %v673_v8, 4 }
 0x1bf   : > { %v675_v54 = vadd.f32 %v674_v50, %v673_v8 }
 0x1c1   : > { %v676_v57 = vrot.slane %v675_v54, 2 }
 0x1c3   : > { %v677_v7 = vadd.f32 %v676_v57, %v675_v54 }
 0x1c5   : > { %v678_v60 = vrot.slane %v677_v7, 1 }
 0x1c7   : > { %v679_v1 = vadd.f32 %v678_v60, %v677_v7 }
 0x1c9   : > { %785 = vpush %v679_v1 }
 0x1fa   : > { %s786_s25 = spop %785 }
 0x1fb   : > { %v681_v61 = vstv %s786_s25 }
 0x1fc   : > { %682 = vst [vmem:[%s203_s4] sm:$0xff] %v681_v61 }
 0x1fd PF: > { %p15_p11 = scmp.ge.s32.totalorder %s978_s14, 4   ;;  %s1601_s9 = smov %s925_s10 }
 0x1fe   : > { %s1602_s10 = smov %s929_s11  ;;  %s1603_s11 = smov %s988_s17 }
 0x1ff   : > { %s1604_s12 = smov %s978_s14  ;;  %17 = sbr.rel (!%p15_p11) target bundleno = 5 (0x5), region = 81 }
 0x206   :  { %702 = vsyncpa [#allocation3], 1 }
 0x207   :  { %704 = vsyncpa [#allocation3 + $0x1], 1 }
 0x208   :  { %705 = vsyncpa [#allocation5], 1 }
 0x209   :  { %707 = vsyncpa [#allocation5 + $0x1], 1 }

</bundles_post_ra>
